<compile_context>
chip_gen: v6e
topology: v6e:2x2x1
jax: 0.10.0
libtpu: 0.0.40
codegen_flags: <defaults>
</compile_context>

<pallas_src>
import jax
import jax.numpy as jnp
from jax.experimental import pallas as pl
from jax.experimental.pallas import tpu as pltpu

_LANES = 128                   # vreg lane width: last dim of blocks is lane-dense
_TARGET_BLOCK_BYTES = 4 << 20  # ~4 MiB per block buffer


def _copy_kernel(x_ref, o_ref):
    # Pure element copy through VMEM (the whole "compute").
    o_ref[...] = x_ref[...]


def _sublane_multiple(dtype) -> int:
    # Packed-sublane requirement: f32 -> 8, bf16 -> 16, int8/fp8 -> 32.
    itemsize = jnp.dtype(dtype).itemsize
    return max(8, 32 // max(itemsize, 1))


def _tiled_copy_2d(a):
    """Memcpy a 2-D array through a 1-D 'parallel' grid of big row blocks."""
    r, c = a.shape
    itemsize = jnp.dtype(a.dtype).itemsize
    sub = _sublane_multiple(a.dtype)

    # ~4 MiB blocks, sublane-aligned row count.
    tile_r = _TARGET_BLOCK_BYTES // max(c * itemsize, 1)
    tile_r = max(sub, (tile_r // sub) * sub)
    if tile_r >= r:
        # Single whole-array block: full-extent dims bypass the (8,128)
        # divisibility rule (covers tiny inputs and narrow feature dims).
        tile_r = r

    grid = (pl.cdiv(r, tile_r),)
    return pl.pallas_call(
        _copy_kernel,
        out_shape=jax.ShapeDtypeStruct((r, c), a.dtype),
        grid=grid,
        # NOTE: pipeline_mode=pl.Buffered(3) on the input spec is a few-%
        # sweep once the grid is long; left at the default depth-2 here.
        in_specs=[pl.BlockSpec((tile_r, c), lambda i: (i, 0))],
        out_specs=pl.BlockSpec((tile_r, c), lambda i: (i, 0)),
        compiler_params=pltpu.CompilerParams(
            # Independent row blocks -> v7x shards the grid over both TCs.
            dimension_semantics=("parallel",),
            # Headroom for the 4 live ~4 MiB block buffers on every gen.
            vmem_limit_bytes=48 << 20,
        ),
    )(a)


def _pallas_identity_copy(x):
    """Materialized copy of x (read + write: the memcpy floor)."""
    n, f = x.shape
    total = n * f
    if total % _LANES == 0:
        # Free contiguous reshape to a lane-dense slab -> full unmasked vst
        # even when f < 128.  No padding, no tail slice, no extra HBM passes.
        out = _tiled_copy_2d(x.reshape(total // _LANES, _LANES))
        return out.reshape(n, f)
    # Ragged total: tile along the leading dim; the last dim stays the full
    # array dim (allowed by the (8,128) rule).  Still exactly 2 HBM passes.
    return _tiled_copy_2d(x)
    # NOTE: with the pad path gone, input_output_aliases={0: 0} under jit with
    # a donated x would make the copy in-place and halve peak HBM footprint;
    # left off so the eager demo can still read x afterwards.


def identical_pool(x, batch=None, *, materialize=False):
    """Pallas/JAX equivalent of IdenticalPool.forward(x, batch) == x.

    Default (materialize=False) is the production path: return x directly —
    zero HBM traffic and zero launch cost, exactly the module's semantics.
    materialize=True exercises the tiled Pallas copy (API-parity test only).
    """
    del batch  # unused by the forward pass, exactly as in the PyTorch module
    if not materialize:
        return x
    return _pallas_identity_copy(x)


if __name__ == "__main__":
    key = jax.random.PRNGKey(0)
    k1, k2 = jax.random.split(key)

    # Small node-feature matrix: 16 nodes, 32 hidden features.
    x = jax.random.normal(k1, (16, 32), dtype=jnp.float32)
    # Per-node graph assignment (2 graphs of 8 nodes) — unused by forward.
    batch = jnp.repeat(jnp.arange(2, dtype=jnp.int32), 8)

    # Default (fast) path: identity, no kernel launch.
    out_fast = jax.block_until_ready(identical_pool(x, batch))
    assert out_fast.shape == x.shape and out_fast.dtype == x.dtype
    assert bool(jnp.all(out_fast == x))

    # Pallas copy path, lane-dense branch (16*32 = 512 is a multiple of 128).
    out_kernel = jax.block_until_ready(identical_pool(x, batch, materialize=True))
    assert out_kernel.shape == x.shape and out_kernel.dtype == x.dtype
    assert bool(jnp.all(out_kernel == x))

    # Pallas copy path, ragged branch (10*40 = 400 is not a multiple of 128).
    x2 = jax.random.normal(k2, (10, 40), dtype=jnp.float32)
    out_ragged = jax.block_until_ready(identical_pool(x2, None, materialize=True))
    assert out_ragged.shape == x2.shape and out_ragged.dtype == x2.dtype
    assert bool(jnp.all(out_ragged == x2))

    print("KERNEL_OK")
</pallas_src>

<mosaic_0001>
module attributes {stable_mosaic.version = 11 : i64} {
  func.func @_copy_kernel(%arg0: i32, %arg1: memref<4x128xf32, #tpu.memory_space<vmem>>, %arg2: memref<4x128xf32, #tpu.memory_space<vmem>>) attributes {dimension_semantics = [#tpu.dimension_semantics<parallel>], iteration_bounds = array<i64: 1>, scalar_prefetch = 0 : i64, scratch_operands = 0 : i64, tpu.core_type = #tpu.core_type<tc>, window_params = [{transform_indices = @transform_0, window_bounds = array<i64: 4, 128>}, {transform_indices = @transform_1, window_bounds = array<i64: 4, 128>}]} {
    %c0 = arith.constant 0 : index
    %c0_0 = arith.constant 0 : index
    %0 = vector.load %arg1[%c0, %c0_0] : memref<4x128xf32, #tpu.memory_space<vmem>>, vector<4x128xf32>
    %c0_1 = arith.constant 0 : index
    %c0_2 = arith.constant 0 : index
    %1 = vector.load %arg2[%c0_1, %c0_2] : memref<4x128xf32, #tpu.memory_space<vmem>>, vector<4x128xf32>
    tpu.vector_store %arg2[%c0_1, %c0_2], %0 {strides = array<i32>} : memref<4x128xf32, #tpu.memory_space<vmem>>, vector<4x128xf32>,
    return
  }
  func.func @transform_0(%arg0: i32) -> (i32, i32) {
    %c0_i32 = arith.constant 0 : i32
    %c0_i32_0 = arith.constant 0 : i32
    return %arg0, %c0_i32 : i32, i32
  }
  func.func @transform_1(%arg0: i32) -> (i32, i32) {
    %c0_i32 = arith.constant 0 : i32
    %c0_i32_0 = arith.constant 0 : i32
    return %arg0, %c0_i32 : i32, i32
  }
}

</mosaic_0001>

<bundles_post_ra>
// kernel: tpu_custom_call.1
= control target key start
LH: loop header
LB: loop body
LE: loop exit
PB: predicated region body
PF: predicated region fallthrough
CT: control target
= control target key end

     0   :  { %6 = vsyncpa [#allocation3], 0  ;;  %s102_s0 = inlined_call_operand.hbm [shape: f32[4,128], index: 0, kind: input, shape index: {}]   ;;  %s103_s1 = inlined_call_operand.hbm [shape: f32[4,128], index: 1, kind: output, shape index: {}]  }
   0x1   :  { %7 = vsyncpa [#allocation4], 0  ;;  %s84_s6 = smov [#allocation2]  }
   0x2   :  { %s14_s7 = sshll.u32 %s84_s6, 4  ;;  %s15_s7 = int_to_ptr.vmem [resolvable:$true] %s14_s7 }
   0x3   :  { %s48_s8 = scalar_lea.vmem %s15_s7, 64  ;;  %p53_p1 = scmp.lt.s32.totalorder %s15_s7, %s15_s7 }
   0x4   :  { %p49_p0 = scmp.ne.s32.totalorder %s15_s7, %s48_s8  ;;  %p54_p2 = scmp.lt.s32.totalorder %s48_s8, %s48_s8 }
   0x6   :  { %p55_p3 = por %p54_p2, %p53_p1 }
   0x8   :  { %p56_p4 = pnand %p55_p3, %p49_p0 }
   0xa   :  { %59 = shalt.err (!%p56_p4)
}
   0xb   :  { %17 = dma.hbm_to_vmem [thread:$0]  %s102_s0, 64, %s15_s7, [#allocation3]  }
   0xc   :  { %80 = dma.done.wait [#allocation3], 64  }
   0xd   :  { %81 = vsyncadd [#allocation3], 4294967232  ;;  %s85_s11 = smov [#allocation5]   ;;  %v21_v0 = vld [vmem:[#allocation2] sm:$0xf] }
   0xe   :  { %s29_s12 = sshll.u32 %s85_s11, 4  ;;  %22 = vst [vmem:[#allocation5] sm:$0xf] %v21_v0  ;;  %s30_s12 = int_to_ptr.vmem [resolvable:$true] %s29_s12 }
   0xf   :  { %s60_s13 = scalar_lea.vmem %s30_s12, 64  ;;  %p65_p6 = scmp.lt.s32.totalorder %s30_s12, %s30_s12 }
  0x10   :  { %p61_p5 = scmp.ne.s32.totalorder %s30_s12, %s60_s13  ;;  %p66_p7 = scmp.lt.s32.totalorder %s60_s13, %s60_s13 }
  0x12   :  { %p67_p8 = por %p66_p7, %p65_p6 }
  0x14   :  { %p68_p9 = pnand %p67_p8, %p61_p5 }
  0x16   :  { %71 = shalt.err (!%p68_p9)
}
  0x17   :  { %32 = dma.vmem_to_hbm [thread:$0]  %s30_s12, 64, %s103_s1, [#allocation4]  }
  0x18   :  { %82 = dma.done.wait [#allocation4], 64  }
  0x19   :  { %83 = vsyncadd [#allocation4], 4294967232 }
  0x1a   :  { %36 = vsyncpa [#allocation3], 1 }
  0x1b   :  { %37 = vsyncpa [#allocation4], 1 }

</bundles_post_ra>
